<compile_context>
chip_gen: v5e
topology: v5e:2x2
jax: 0.10.0
libtpu: 0.0.40
codegen_flags: <defaults>
</compile_context>

<pallas_src>
import math

import jax
import jax.numpy as jnp
from jax.experimental import pallas as pl
from jax.experimental.pallas import tpu as pltpu


def center_kernel(x_ref, w_ref, o_ref):
    # (tile_rows, k*F) @ (k*F, k) on the MXU, f32 accumulation.
    z = jnp.dot(x_ref[...], w_ref[...], preferred_element_type=jnp.float32)
    # -logsigmoid(-z) == softplus(z), numerically stable form.
    sp = jnp.maximum(z, 0.0) + jnp.log1p(jnp.exp(-jnp.abs(z)))
    o_ref[...] = sp.astype(o_ref.dtype)


def _round_up(a, m):
    return ((a + m - 1) // m) * m


def _vmem_capacity_bytes():
    try:
        return int(pltpu.get_tpu_info().vmem_capacity_bytes)
    except Exception:
        return 64 * 1024 * 1024  # conservative fallback (v7x per-TensorCore VMEM)


def _pick_fold(n_rows, feat, itemsize, buf_budget):
    """Largest fold factor k such that:
       * k divides n_rows (the (N,F)->(N/k, k*F) reshape is a free bitcast, no pad copy),
       * the block-diagonal weight (k*F, k) stays <= 2 MiB (VMEM-resident),
       * at least 8 folded rows fit in one x buffer,
       * k <= 32 so the k-times-redundant MXU FLOPs stay well below HBM time
         even for f32 matmuls on v7x's 3.2 TB/s HBM.
    Prefers k with k*F a multiple of 128 (lane-dense folded x rows)."""
    w_budget = 2 * 1024 * 1024

    def ok(k):
        return (n_rows % k == 0
                and k * k * feat * itemsize <= w_budget
                and 8 * k * feat * itemsize <= buf_budget)

    candidates = (32, 16, 8, 4, 2)
    for k in candidates:
        if ok(k) and (k * feat) % 128 == 0:
            return k
    for k in candidates:
        if ok(k):
            return k
    return 1  # degenerate fallback: lane-sparse output (rare: only for huge F)


def _pick_tile_rows(n_rows, row_bytes, buf_budget):
    """Rows of folded x per VMEM buffer: as large as the budget allows, preferring
    tile counts that divide n_rows exactly (no partial trailing block) and give an
    even number of grid steps (v7x dual-TensorCore load balance)."""
    max_rows = max(8, ((buf_budget // row_bytes) // 8) * 8)

    if n_rows <= max_rows:
        # Whole folded input fits in a single buffer.  Split into a small even grid
        # when tiles stay full multiples of 8 rows (keeps both v7x cores busy at
        # negligible per-step cost); otherwise use one full-array block.
        for parts in (4, 2):
            if n_rows % (8 * parts) == 0:
                return n_rows // parts
        return n_rows

    best_any = None
    best_even = None
    t = max_rows
    while t >= 8 and (best_any is None or best_even is None):
        if n_rows % t == 0:
            if best_any is None:
                best_any = t
            if best_even is None and (n_rows // t) % 2 == 0:
                best_even = t
        t -= 8
    if best_even is not None and 2 * best_even >= best_any:
        return best_even
    if best_any is not None:
        return best_any
    # No exact divisor: accept a partial trailing block (still cheaper than
    # materializing a padded copy of x in HBM for a memory-bound kernel).
    return max_rows


def _center_matvec(x, w, buf_budget, vmem_limit):
    """softplus(x @ w) via Pallas.  x: (R, W), w: (W, C) -> (R, C) in x.dtype."""
    R, W = x.shape
    C = w.shape[1]
    itemsize = jnp.dtype(x.dtype).itemsize

    tile_rows = _pick_tile_rows(R, W * itemsize, buf_budget)
    grid = (pl.cdiv(R, tile_rows),)

    cost = pl.CostEstimate(
        flops=2 * R * W * C,
        transcendentals=2 * R * C,
        bytes_accessed=itemsize * (R * W + W * C + R * C),
    )

    return pl.pallas_call(
        center_kernel,
        out_shape=jax.ShapeDtypeStruct((R, C), x.dtype),
        grid_spec=pltpu.PrefetchScalarGridSpec(
            num_scalar_prefetch=0,
            grid=grid,
            in_specs=[
                # x row tile: streamed / double-buffered over the grid.
                pl.BlockSpec((tile_rows, W), lambda i: (i, 0)),
                # folded weight: constant block index -> stays resident in VMEM.
                pl.BlockSpec((W, C), lambda i: (0, 0)),
            ],
            out_specs=pl.BlockSpec((tile_rows, C), lambda i: (i, 0)),
        ),
        compiler_params=pltpu.CompilerParams(
            dimension_semantics=("parallel",),
            vmem_limit_bytes=vmem_limit,
        ),
        cost_estimate=cost,
    )(x, w)


def center_forward(x, w, *, buf_budget_bytes=None):
    """Center.forward: -logsigmoid(-(x @ w)) == softplus(x @ w)."""
    N, F = x.shape
    assert w.shape == (F, 1)
    itemsize = jnp.dtype(x.dtype).itemsize

    capacity = _vmem_capacity_bytes()
    if buf_budget_bytes is None:
        # ~8 MiB per x buffer on v7x (64 MiB VMEM/TC), ~12 MiB on v5e/v6e (128 MiB).
        buf_budget_bytes = min(12 * 1024 * 1024, capacity // 8)
    vmem_limit = min((capacity * 3) // 4, 64 * 1024 * 1024)

    # Rows must be a multiple of 8 (f32 sublane).  Pad (one HBM copy) only if needed.
    N_work = _round_up(max(N, 8), 8)
    x_work = x if N_work == N else jnp.pad(x, ((0, N_work - N), (0, 0)))

    # Fold k rows per matmul row -> k-times lane-denser epilogue and output store.
    k = _pick_fold(N_work, F, itemsize, buf_budget_bytes)
    R = N_work // k
    if k > 1:
        x_fold = x_work.reshape(R, k * F)                      # free row-major bitcast
        w_fold = jnp.kron(jnp.eye(k, dtype=w.dtype), w)        # (k*F, k) block-diagonal
    else:
        x_fold = x_work
        w_fold = w
    w_fold = w_fold.astype(x.dtype)

    out_fold = _center_matvec(x_fold, w_fold, buf_budget_bytes, vmem_limit)
    return out_fold.reshape(N_work, 1)[:N]


def reference_forward(x, w):
    return -jax.nn.log_sigmoid(-(x @ w))


if __name__ == "__main__":
    key = jax.random.PRNGKey(0)
    keys = jax.random.split(key, 8)
    stdv = 1.0 / math.sqrt(1)  # weight.size(1) == 1

    def make(i, N, F):
        x = jax.random.normal(keys[i], (N, F), dtype=jnp.float32)
        w = jax.random.uniform(keys[i + 1], (F, 1), dtype=jnp.float32,
                               minval=-stdv, maxval=stdv)
        return x, w

    # 1) Module-sized case (batch=8, in_features=32): k=8 fold, single block.
    x, w = make(0, 8, 32)
    out = jax.block_until_ready(center_forward(x, w))
    ref = reference_forward(x, w)
    assert out.shape == (8, 1)
    assert jnp.allclose(out, ref, atol=1e-5, rtol=1e-5)

    # 2) k=32 fold, fully even 2-step grid.
    x, w = make(2, 512, 32)
    out = jax.block_until_ready(center_forward(x, w))
    ref = reference_forward(x, w)
    assert out.shape == (512, 1)
    assert jnp.allclose(out, ref, atol=1e-3, rtol=1e-3)

    # 3) Multi-step grid with an exact-divisor, even step count (VMEM budget forced
    #    small so the test shapes stay tiny while still exercising grid > 1).
    x, w = make(4, 4096, 128)
    out = jax.block_until_ready(center_forward(x, w, buf_budget_bytes=512 * 1024))
    ref = reference_forward(x, w)
    assert out.shape == (4096, 1)
    assert jnp.allclose(out, ref, atol=1e-3, rtol=1e-3)

    # 4) Row count with no clean divisor -> partial trailing block path.
    x, w = make(6, 1000, 64)
    out = jax.block_until_ready(center_forward(x, w, buf_budget_bytes=64 * 1024))
    ref = reference_forward(x, w)
    assert out.shape == (1000, 1)
    assert jnp.allclose(out, ref, atol=1e-3, rtol=1e-3)

    print("KERNEL_OK")
</pallas_src>

<mosaic_0001>
module attributes {stable_mosaic.version = 11 : i64} {
  func.func @center_kernel(%arg0: i32, %arg1: memref<1x256xf32, #tpu.memory_space<vmem>>, %arg2: memref<256x8xf32, #tpu.memory_space<vmem>>, %arg3: memref<1x8xf32, #tpu.memory_space<vmem>>) attributes {dimension_semantics = [#tpu.dimension_semantics<parallel>], iteration_bounds = array<i64: 1>, scalar_prefetch = 0 : i64, scratch_operands = 0 : i64, tpu.core_type = #tpu.core_type<tc>, window_params = [{transform_indices = @transform_0, window_bounds = array<i64: 1, 256>}, {pipeline_mode = #tpu.pipeline_mode<synchronous>, transform_indices = @transform_1, window_bounds = array<i64: 256, 8>}, {transform_indices = @transform_2, window_bounds = array<i64: 1, 8>}]} {
    %c0 = arith.constant 0 : index
    %c0_0 = arith.constant 0 : index
    %0 = vector.load %arg1[%c0, %c0_0] : memref<1x256xf32, #tpu.memory_space<vmem>>, vector<1x256xf32>
    %c0_1 = arith.constant 0 : index
    %c0_2 = arith.constant 0 : index
    %1 = vector.load %arg2[%c0_1, %c0_2] : memref<256x8xf32, #tpu.memory_space<vmem>>, vector<256x8xf32>
    %cst = arith.constant dense<0.000000e+00> : vector<1x8xf32>
    %2 = tpu.matmul %0, %1, %cst {dimension_numbers = #tpu.dot_dimension_numbers<[1], [0], [0], [1], [0, 0, 1, 1], [], []>} : vector<1x256xf32>, vector<256x8xf32>, vector<1x8xf32> -> vector<1x8xf32>
    %cst_3 = arith.constant 0.000000e+00 : f32
    %3 = vector.broadcast %cst_3 : f32 to vector<1x8xf32>
    %4 = arith.maximumf %2, %3 : vector<1x8xf32>
    %5 = math.absf %2 : vector<1x8xf32>
    %cst_4 = arith.constant 0.000000e+00 : f32
    %6 = vector.broadcast %cst_4 : f32 to vector<1x8xf32>
    %7 = arith.subf %6, %5 : vector<1x8xf32>
    %8 = math.exp %7 : vector<1x8xf32>
    %9 = math.log1p %8 : vector<1x8xf32>
    %10 = arith.addf %4, %9 : vector<1x8xf32>
    %c0_5 = arith.constant 0 : index
    %c0_6 = arith.constant 0 : index
    %11 = vector.load %arg3[%c0_5, %c0_6] : memref<1x8xf32, #tpu.memory_space<vmem>>, vector<1x8xf32>
    tpu.vector_store %arg3[%c0_5, %c0_6], %10 {strides = array<i32>} : memref<1x8xf32, #tpu.memory_space<vmem>>, vector<1x8xf32>,
    return
  }
  func.func @transform_0(%arg0: i32) -> (i32, i32) {
    %c0_i32 = arith.constant 0 : i32
    %c0_i32_0 = arith.constant 0 : i32
    return %arg0, %c0_i32 : i32, i32
  }
  func.func @transform_1(%arg0: i32) -> (i32, i32) {
    %c0_i32 = arith.constant 0 : i32
    %c0_i32_0 = arith.constant 0 : i32
    %c0_i32_1 = arith.constant 0 : i32
    return %c0_i32, %c0_i32_0 : i32, i32
  }
  func.func @transform_2(%arg0: i32) -> (i32, i32) {
    %c0_i32 = arith.constant 0 : i32
    %c0_i32_0 = arith.constant 0 : i32
    return %arg0, %c0_i32 : i32, i32
  }
}

</mosaic_0001>

<bundles_post_ra>
// kernel: tpu_custom_call.1
= control target key start
LH: loop header
LB: loop body
LE: loop exit
PB: predicated region body
PF: predicated region fallthrough
CT: control target
= control target key end

     0   :  { %s272_s0 = inlined_call_operand.vmem [shape: f32[1,256], index: 0, kind: input, shape index: {}]   ;;  %s273_s1 = inlined_call_operand.vmem [shape: f32[256,8], index: 1, kind: input, shape index: {}]   ;;  %s274_s2 = inlined_call_operand.hbm [shape: f32[1,8], index: 2, kind: output, shape index: {}]  }
   0x1   :  { %v28_v0 = vld [vmem:[%s273_s1 + $0x78] sm:$0xff]  ;;  %v27_v2 = vld [vmem:[%s273_s1 + $0x70] sm:$0xff]  ;;  %v26_v4 = vld [vmem:[%s273_s1 + $0x68] sm:$0xff] }
   0x2   :  { %v44_v1 = vld [vmem:[%s273_s1 + $0xf8] sm:$0xff]  ;;  %50 = vmatpush.msra.mxu0 %v28_v0  ;;  %v43_v3 = vld [vmem:[%s273_s1 + $0xf0] sm:$0xff]  ;;  %v42_v5 = vld [vmem:[%s273_s1 + $0xe8] sm:$0xff] }
   0x3   :  { %70 = vmatpush.msra.mxu1 %v44_v1  ;;  %v25_v6 = vld [vmem:[%s273_s1 + $0x60] sm:$0xff]  ;;  %v24_v8 = vld [vmem:[%s273_s1 + $0x58] sm:$0xff]  ;;  %v23_v10 = vld [vmem:[%s273_s1 + $0x50] sm:$0xff] }
   0x4   :  { %51 = vmatpush.msra.mxu0 %v27_v2  ;;  %v41_v7 = vld [vmem:[%s273_s1 + $0xe0] sm:$0xff]  ;;  %v40_v9 = vld [vmem:[%s273_s1 + $0xd8] sm:$0xff]  ;;  %v39_v11 = vld [vmem:[%s273_s1 + $0xd0] sm:$0xff] }
   0x5   :  { %71 = vmatpush.msra.mxu1 %v43_v3  ;;  %v22_v12 = vld [vmem:[%s273_s1 + $0x48] sm:$0xff] }
   0x6   :  { %52 = vmatpush.msra.mxu0 %v26_v4  ;;  %v38_v13 = vld [vmem:[%s273_s1 + $0xc8] sm:$0xff] }
   0x7   :  { %72 = vmatpush.msra.mxu1 %v42_v5 }
   0x8   :  { %53 = vmatpush.msra.mxu0 %v25_v6 }
   0x9   :  { %73 = vmatpush.msra.mxu1 %v41_v7 }
   0xa   :  { %54 = vmatpush.msra.mxu0 %v24_v8 }
   0xb   :  { %74 = vmatpush.msra.mxu1 %v40_v9 }
   0xc   :  { %55 = vmatpush.msra.mxu0 %v23_v10 }
   0xd   :  { %75 = vmatpush.msra.mxu1 %v39_v11 }
   0xe   :  { %7 = vsyncpa [#allocation3], 0  ;;  %v21_v14 = vld [vmem:[%s273_s1 + $0x40] sm:$0xff]  ;;  %56 = vmatpush.msra.mxu0 %v22_v12  ;;  %v20_v16 = vld [vmem:[%s273_s1 + $0x38] sm:$0xff]  ;;  %s114_s21 = sshll.u32 %s274_s2, 4  ;;  %vm105_vm1 = vcmask 57344   ;;  %s115_s21 = int_to_ptr.hbm [resolvable:$true] %s114_s21 }
   0xf   :  { %v37_v15 = vld [vmem:[%s273_s1 + $0xc0] sm:$0xff]  ;;  %76 = vmatpush.msra.mxu1 %v38_v13  ;;  %v36_v17 = vld [vmem:[%s273_s1 + $0xb8] sm:$0xff]  ;;  %v19_v18 = vld [vmem:[%s273_s1 + $0x30] sm:$0xff] }
  0x10   :  { %57 = vmatpush.msra.mxu0 %v21_v14  ;;  %v35_v19 = vld [vmem:[%s273_s1 + $0xb0] sm:$0xff]  ;;  %v18_v20 = vld [vmem:[%s273_s1 + $0x28] sm:$0xff]  ;;  %v17_v22 = vld [vmem:[%s273_s1 + $0x20] sm:$0xff] }
  0x11   :  { %77 = vmatpush.msra.mxu1 %v37_v15  ;;  %v34_v21 = vld [vmem:[%s273_s1 + $0xa8] sm:$0xff]  ;;  %v33_v23 = vld [vmem:[%s273_s1 + $0xa0] sm:$0xff]  ;;  %v16_v24 = vld [vmem:[%s273_s1 + $0x18] sm:$0xff] }
  0x12   :  { %58 = vmatpush.msra.mxu0 %v20_v16  ;;  %v32_v25 = vld [vmem:[%s273_s1 + $0x98] sm:$0xff]  ;;  %v15_v26 = vld [vmem:[%s273_s1 + $0x10] sm:$0xff]  ;;  %v12_v28 = vld [vmem:[%s272_s0] sm:$0x3]  ;;  %s154_s0 = smov [#allocation2]  }
  0x13   :  { %78 = vmatpush.msra.mxu1 %v36_v17  ;;  %v31_v27 = vld [vmem:[%s273_s1 + $0x90] sm:$0xff]  ;;  %v14_v29 = vld [vmem:[%s273_s1 + $0x8] sm:$0xff]  ;;  %v13_v31 = vld [vmem:[%s273_s1] sm:$0xff]  ;;  %v46_v33 = vperm.slane %v12_v28, 0  ;;  %v47_v34 = vperm.slane %v12_v28, 1 }
  0x14   :  { %59 = vmatpush.msra.mxu0 %v19_v18  ;;  %v30_v30 = vld [vmem:[%s273_s1 + $0x88] sm:$0xff]  ;;  %v29_v32 = vld [vmem:[%s273_s1 + $0x80] sm:$0xff]  ;;  %s112_s1 = sshll.u32 %s154_s0, 4  ;;  %s113_s1 = int_to_ptr.vmem [resolvable:$true] %s112_s1 }
  0x15   :  { %79 = vmatpush.msra.mxu1 %v35_v19 }
  0x16   :  { %60 = vmatpush.msra.mxu0 %v18_v20 }
  0x17   :  { %80 = vmatpush.msra.mxu1 %v34_v21 }
  0x18   :  { %61 = vmatpush.msra.mxu0 %v17_v22 }
  0x19   :  { %81 = vmatpush.msra.mxu1 %v33_v23 }
  0x1a   :  { %62 = vmatpush.msra.mxu0 %v16_v24 }
  0x1b   :  { %82 = vmatpush.msra.mxu1 %v32_v25 }
  0x1c   :  { %63 = vmatpush.msra.mxu0 %v15_v26 }
  0x1d   :  { %83 = vmatpush.msra.mxu1 %v31_v27 }
  0x1e   :  { %64 = vmatpush.msra.mxu0 %v14_v29 }
  0x1f   :  { %84 = vmatpush.msra.mxu1 %v30_v30 }
  0x20   :  { %65 = vmatpush.msra.mxu0 %v13_v31 }
  0x21   :  { %85 = vmatpush.msra.mxu1 %v29_v32  ;;  %66 = vmatmul.f32.vlgmr.msra.gmra.mxu0 %v46_v33 }
  0x22   :  { %86 = vmatmul.f32.vlgmr.msra.gmra.mxu1 %v47_v34 }
  0x9e   :  { %v67_v35 = vpop.f32.mrf.mxu0 }
  0x9f   :  { %v87_v36 = vpop.f32.mrf.mxu1 }
  0xa0   :  { %v88_v37 = vadd.f32 %v87_v36, %v67_v35 }
  0xa2   :  { %v91_v38 = vand.u32 2147483647, %v88_v37  ;;  %v90_v49 = vmax.f32 %v88_v37, 0.0 }
  0xa4   :  { %v92_v39 = vsub.f32 0.0, %v91_v38 }
  0xa6   :  { %v93_v40 = vmul.f32 1.442695, %v92_v39 }
  0xa8   :  { %124 = vpow2.f32 %v93_v40 }
  0xae   :  { %v125_v41 = vpop.eup %124 }
  0xaf   :  { %v95_v42 = vadd.f32 1.0, %v125_v41  ;;  %v98_v43 = vmul.f32 -0.5, %v125_v41  ;;  %v101_v45 = vand.u32 2147483647, %v125_v41 }
  0xb1   :  { %126 = vlog2.f32 %v95_v42  ;;  %v99_v44 = vadd.f32 1.0, %v98_v43  ;;  %vm102_vm0 = vcmp.lt.f32.partialorder %v101_v45, 0.0004427343 }
  0xb3   :  { %v100_v48 = vmul.f32 %v125_v41, %v99_v44 }
  0xb7   :  { %v127_v46 = vpop.eup %126 }
  0xb8   :  { %v97_v47 = vmul.f32 0.6931472, %v127_v46 }
  0xba   :  { %v103_v50 = vsel %vm102_vm0, %v100_v48, %v97_v47 }
  0xbb   :  { %v104_v51 = vadd.f32 %v103_v50, %v90_v49 }
  0xbd   :  { %106 = vst.msk [vmem:[#allocation2] sm:$0x1] %vm105_vm1, %v104_v51 }
  0xbe   :  { %117 = dma.vmem_to_hbm [thread:$0]  %s113_s1, 16, %s115_s21, [#allocation3]  }
  0xbf   :  { %152 = dma.done.wait [#allocation3], 16  }
  0xc0   :  { %153 = vsyncadd [#allocation3], 4294967280 }
  0xc1   :  { %122 = vsyncpa [#allocation3], 1 }

</bundles_post_ra>
